<compile_context>
chip_gen: v7x
topology: tpu7x:2x2x1
jax: 0.10.0
libtpu: 0.0.40
codegen_flags: <defaults>
</compile_context>

<pallas_src>
import jax
import jax.numpy as jnp
import numpy as np
from jax import lax
from jax.experimental import pallas as pl
from jax.experimental.pallas import tpu as pltpu

SELU_ALPHA = 1.6732632423543772
SELU_SCALE = 1.0507009873554805
BN_EPS = 1e-5


def _selu(x):
    # scale * (x if x > 0 else alpha*(exp(x)-1)); min() avoids overflow on the
    # unselected branch.
    neg = SELU_ALPHA * (jnp.exp(jnp.minimum(x, 0.0)) - 1.0)
    return SELU_SCALE * jnp.where(x > 0, x, neg)


# ---------------------------------------------------------------------------
# Host-side (wrapper) operator packing — pure layout/weight plumbing, no compute
# ---------------------------------------------------------------------------
def _tile_vec(v, reps):
    """Per-channel param (C,) -> lane-dense (1, reps*C) matching lane l = ...*C + c."""
    v = np.asarray(v, np.float32)
    return jnp.asarray(np.tile(v, reps)[None, :])


def _channel_sum_matrix(lanes, C):
    """S[j, l] = 1 iff j % C == l % C  (per-channel sum, broadcast back to every lane)."""
    return jnp.asarray(np.kron(np.ones((lanes // C, lanes // C), np.float32),
                               np.eye(C, dtype=np.float32)))


def _row_tap_matrix(H):
    """Rcat[h, ky*H + h'] = 1 iff h' == h + ky - 1  (h-boundary zero padding baked in)."""
    R = np.zeros((H, 3 * H), np.float32)
    for ky in range(3):
        dy = ky - 1
        for h in range(H):
            hp = h + dy
            if 0 <= hp < H:
                R[h, ky * H + hp] = 1.0
    return jnp.asarray(R)


def _lane_mix_matrix(w_oihw, N, W):
    """PyTorch OIHW conv weight -> Mh = hstack_ky kron(I_N, Mblk[ky]), (N*W*C, 3*N*W*C).

    Mblk[ky, wi*C + ci, wo*C + co] = Wt[ky, (wi - wo) + 1, ci, co] for |wi - wo| <= 1,
    where Wt is the HWIO weight; w-boundary "same" zero padding baked in.
    """
    w = np.asarray(w_oihw, np.float32)
    cout, cin, _, _ = w.shape
    wt = np.transpose(w, (2, 3, 1, 0))  # HWIO: (3, 3, Cin, Cout)
    Mblk = np.zeros((3, W * cin, W * cout), np.float32)
    for ky in range(3):
        for wo in range(W):
            for kx in range(3):
                wi = wo + (kx - 1)
                if 0 <= wi < W:
                    Mblk[ky, wi * cin:(wi + 1) * cin, wo * cout:(wo + 1) * cout] = wt[ky, kx]
    eyeN = np.eye(N, dtype=np.float32)
    blocks = [np.kron(eyeN, Mblk[ky]) for ky in range(3)]     # each (N*W*C, N*W*C)
    return jnp.asarray(np.concatenate(blocks, axis=1))        # (N*W*C, 3*N*W*C)


# ---------------------------------------------------------------------------
# Kernel
# ---------------------------------------------------------------------------
def _make_kernel(inv_count, lanes):
    def kernel(x_ref, s_ref, rcat_ref,
               g1_ref, be1_ref, mh1_ref, b1_ref,
               g2_ref, be2_ref, mh2_ref, b2_ref,
               o_ref):
        x = x_ref[...]          # (H, N*W*C) f32, lane-dense slab
        S = s_ref[...]          # (lanes, lanes) channel-sum matrix
        Rcat = rcat_ref[...]    # (H, 3*H) vertical-tap matrix

        def block(a, gvec, bevec, mh_ref, bvec):
            # ---- BatchNorm2d (training mode): reduce rows first, then tiny dots ----
            colsum = jnp.sum(a, axis=0, keepdims=True)            # (1, lanes)  XLU
            colsumsq = jnp.sum(a * a, axis=0, keepdims=True)      # (1, lanes)  XLU
            mean = jnp.dot(colsum, S, preferred_element_type=jnp.float32) * inv_count
            ex2 = jnp.dot(colsumsq, S, preferred_element_type=jnp.float32) * inv_count
            var = ex2 - mean * mean                               # biased variance
            scale = gvec * lax.rsqrt(var + BN_EPS)
            shift = bevec - mean * scale

            # ---- SELU (folded BN affine feeds straight in) ----
            a = _selu(a * scale + shift)

            # ---- 3x3 "same" conv: two MXU matmuls, zero padding baked into Mh/Rcat ----
            B = jnp.dot(a, mh_ref[...], preferred_element_type=jnp.float32)   # (H, 3*lanes)
            V = jnp.concatenate(
                [B[:, :lanes], B[:, lanes:2 * lanes], B[:, 2 * lanes:]],
                axis=0)                                                       # (3*H, lanes)
            return jnp.dot(Rcat, V, preferred_element_type=jnp.float32) + bvec

        h = block(x, g1_ref[...], be1_ref[...], mh1_ref, b1_ref[...])   # layer1
        h = block(h, g2_ref[...], be2_ref[...], mh2_ref, b2_ref[...])   # layer2
        o_ref[...] = h + x                                              # residual add

    return kernel


def resunit_forward_nhwc(x_nhwc, params):
    N, H, W, C = x_nhwc.shape
    (g1, be1, w1, b1), (g2, be2, w2, b2) = params
    rows, lanes = H, N * W * C

    # Layout plumbing (wrapper-side only): NHWC -> lane-dense (H, N*W*C) slab.
    x_slab = jnp.transpose(x_nhwc, (1, 0, 2, 3)).reshape(rows, lanes).astype(jnp.float32)

    S = _channel_sum_matrix(lanes, C)
    Rcat = _row_tap_matrix(H)
    mh1 = _lane_mix_matrix(w1, N, W)
    mh2 = _lane_mix_matrix(w2, N, W)
    reps = N * W
    g1v, be1v, b1v = _tile_vec(g1, reps), _tile_vec(be1, reps), _tile_vec(b1, reps)
    g2v, be2v, b2v = _tile_vec(g2, reps), _tile_vec(be2, reps), _tile_vec(b2, reps)

    kernel = _make_kernel(1.0 / float(N * H * W), lanes)

    def full_spec(shape):
        nd = len(shape)
        return pl.BlockSpec(shape, lambda i, _nd=nd: (0,) * _nd)

    args = (x_slab, S, Rcat, g1v, be1v, mh1, b1v, g2v, be2v, mh2, b2v)

    out_slab = pl.pallas_call(
        kernel,
        out_shape=jax.ShapeDtypeStruct((rows, lanes), jnp.float32),
        grid=(1,),
        in_specs=[full_spec(a.shape) for a in args],
        out_specs=pl.BlockSpec((rows, lanes), lambda i: (0, 0)),
        compiler_params=pltpu.CompilerParams(
            dimension_semantics=("arbitrary",),
        ),
    )(*args)

    return jnp.transpose(out_slab.reshape(rows, N, W, C), (1, 0, 2, 3))


# ---------------------------------------------------------------------------
# Pure-JAX reference and parameter construction
# ---------------------------------------------------------------------------
def resunit_reference_nhwc(x, params):
    """(training-mode BN -> SELU -> conv3x3) x2 + residual, straight JAX."""

    def block(a, g, be, w_oihw, b):
        mean = jnp.mean(a, axis=(0, 1, 2), keepdims=True)
        var = jnp.mean(jnp.square(a - mean), axis=(0, 1, 2), keepdims=True)
        a = (a - mean) / jnp.sqrt(var + BN_EPS)
        a = a * g.reshape(1, 1, 1, -1) + be.reshape(1, 1, 1, -1)
        a = _selu(a)
        w_hwio = jnp.transpose(w_oihw, (2, 3, 1, 0))
        y = lax.conv_general_dilated(a, w_hwio, (1, 1), "SAME",
                                     dimension_numbers=("NHWC", "HWIO", "NHWC"))
        return y + b.reshape(1, 1, 1, -1)

    (g1, be1, w1, b1), (g2, be2, w2, b2) = params
    h = block(x, g1, be1, w1, b1)
    h = block(h, g2, be2, w2, b2)
    return h + x


def init_params(key, C):
    """Deterministic synthetic parameters matching ResUnit.__init__ shapes (PyTorch conv)."""
    ks = jax.random.split(key, 8)

    def layer(kg, kb, kw, kbias):
        gamma = (1.0 + 0.1 * jax.random.normal(kg, (C,))).astype(jnp.float32)
        beta = (0.1 * jax.random.normal(kb, (C,))).astype(jnp.float32)
        w = (0.2 * jax.random.normal(kw, (C, C, 3, 3))).astype(jnp.float32)  # OIHW
        bias = (0.05 * jax.random.normal(kbias, (C,))).astype(jnp.float32)
        return (gamma, beta, w, bias)

    return (layer(ks[0], ks[1], ks[2], ks[3]), layer(ks[4], ks[5], ks[6], ks[7]))


if __name__ == "__main__":
    N, C, H, W = 2, 4, 16, 16
    key = jax.random.PRNGKey(0)
    kx, kp = jax.random.split(key)

    # PyTorch-convention input (NCHW), transposed to NHWC at the wrapper boundary.
    x_nchw = jax.random.normal(kx, (N, C, H, W), dtype=jnp.float32)
    x_nhwc = jnp.transpose(x_nchw, (0, 2, 3, 1))

    params = init_params(kp, C)

    out_nhwc = resunit_forward_nhwc(x_nhwc, params)
    out_nhwc = jax.block_until_ready(out_nhwc)

    ref_nhwc = resunit_reference_nhwc(x_nhwc, params)
    np.testing.assert_allclose(np.asarray(out_nhwc), np.asarray(ref_nhwc),
                               rtol=1e-4, atol=1e-4)

    out_nchw = jnp.transpose(out_nhwc, (0, 3, 1, 2))  # back to PyTorch NCHW
    assert out_nchw.shape == x_nchw.shape
    print("KERNEL_OK")
</pallas_src>

<mosaic_0001>
module attributes {stable_mosaic.version = 11 : i64} {
  func.func @kernel(%arg0: i32, %arg1: memref<16x128xf32, #tpu.memory_space<vmem>>, %arg2: memref<128x128xf32, #tpu.memory_space<vmem>>, %arg3: memref<16x48xf32, #tpu.memory_space<vmem>>, %arg4: memref<1x128xf32, #tpu.memory_space<vmem>>, %arg5: memref<1x128xf32, #tpu.memory_space<vmem>>, %arg6: memref<128x384xf32, #tpu.memory_space<vmem>>, %arg7: memref<1x128xf32, #tpu.memory_space<vmem>>, %arg8: memref<1x128xf32, #tpu.memory_space<vmem>>, %arg9: memref<1x128xf32, #tpu.memory_space<vmem>>, %arg10: memref<128x384xf32, #tpu.memory_space<vmem>>, %arg11: memref<1x128xf32, #tpu.memory_space<vmem>>, %arg12: memref<16x128xf32, #tpu.memory_space<vmem>>) attributes {dimension_semantics = [#tpu.dimension_semantics<arbitrary>], iteration_bounds = array<i64: 1>, scalar_prefetch = 0 : i64, scratch_operands = 0 : i64, tpu.core_type = #tpu.core_type<tc>, window_params = [{pipeline_mode = #tpu.pipeline_mode<synchronous>, transform_indices = @transform_0, window_bounds = array<i64: 16, 128>}, {pipeline_mode = #tpu.pipeline_mode<synchronous>, transform_indices = @transform_1, window_bounds = array<i64: 128, 128>}, {pipeline_mode = #tpu.pipeline_mode<synchronous>, transform_indices = @transform_2, window_bounds = array<i64: 16, 48>}, {pipeline_mode = #tpu.pipeline_mode<synchronous>, transform_indices = @transform_3, window_bounds = array<i64: 1, 128>}, {pipeline_mode = #tpu.pipeline_mode<synchronous>, transform_indices = @transform_4, window_bounds = array<i64: 1, 128>}, {pipeline_mode = #tpu.pipeline_mode<synchronous>, transform_indices = @transform_5, window_bounds = array<i64: 128, 384>}, {pipeline_mode = #tpu.pipeline_mode<synchronous>, transform_indices = @transform_6, window_bounds = array<i64: 1, 128>}, {pipeline_mode = #tpu.pipeline_mode<synchronous>, transform_indices = @transform_7, window_bounds = array<i64: 1, 128>}, {pipeline_mode = #tpu.pipeline_mode<synchronous>, transform_indices = @transform_8, window_bounds = array<i64: 1, 128>}, {pipeline_mode = #tpu.pipeline_mode<synchronous>, transform_indices = @transform_9, window_bounds = array<i64: 128, 384>}, {pipeline_mode = #tpu.pipeline_mode<synchronous>, transform_indices = @transform_10, window_bounds = array<i64: 1, 128>}, {pipeline_mode = #tpu.pipeline_mode<synchronous>, transform_indices = @transform_11, window_bounds = array<i64: 16, 128>}]} {
    %c0 = arith.constant 0 : index
    %c0_0 = arith.constant 0 : index
    %0 = vector.load %arg1[%c0, %c0_0] : memref<16x128xf32, #tpu.memory_space<vmem>>, vector<16x128xf32>
    %c0_1 = arith.constant 0 : index
    %c0_2 = arith.constant 0 : index
    %1 = vector.load %arg2[%c0_1, %c0_2] : memref<128x128xf32, #tpu.memory_space<vmem>>, vector<128x128xf32>
    %c0_3 = arith.constant 0 : index
    %c0_4 = arith.constant 0 : index
    %2 = vector.load %arg3[%c0_3, %c0_4] : memref<16x48xf32, #tpu.memory_space<vmem>>, vector<16x48xf32>
    %c0_5 = arith.constant 0 : index
    %c0_6 = arith.constant 0 : index
    %3 = vector.load %arg4[%c0_5, %c0_6] : memref<1x128xf32, #tpu.memory_space<vmem>>, vector<1x128xf32>
    %c0_7 = arith.constant 0 : index
    %c0_8 = arith.constant 0 : index
    %4 = vector.load %arg5[%c0_7, %c0_8] : memref<1x128xf32, #tpu.memory_space<vmem>>, vector<1x128xf32>
    %c0_9 = arith.constant 0 : index
    %c0_10 = arith.constant 0 : index
    %5 = vector.load %arg7[%c0_9, %c0_10] : memref<1x128xf32, #tpu.memory_space<vmem>>, vector<1x128xf32>
    %cst = arith.constant dense<0.000000e+00> : vector<128xf32>
    %6 = vector.multi_reduction <add>, %0, %cst [0] : vector<16x128xf32> to vector<128xf32>
    %7 = vector.shape_cast %6 : vector<128xf32> to vector<1x128xf32>
    %8 = arith.mulf %0, %0 : vector<16x128xf32>
    %cst_11 = arith.constant dense<0.000000e+00> : vector<128xf32>
    %9 = vector.multi_reduction <add>, %8, %cst_11 [0] : vector<16x128xf32> to vector<128xf32>
    %10 = vector.shape_cast %9 : vector<128xf32> to vector<1x128xf32>
    %cst_12 = arith.constant dense<0.000000e+00> : vector<1x128xf32>
    %11 = tpu.matmul %7, %1, %cst_12 {dimension_numbers = #tpu.dot_dimension_numbers<[1], [0], [0], [1], [0, 0, 1, 1], [], []>} : vector<1x128xf32>, vector<128x128xf32>, vector<1x128xf32> -> vector<1x128xf32>
    %cst_13 = arith.constant 0.001953125 : f32
    %12 = vector.broadcast %cst_13 : f32 to vector<1x128xf32>
    %13 = arith.mulf %11, %12 : vector<1x128xf32>
    %cst_14 = arith.constant dense<0.000000e+00> : vector<1x128xf32>
    %14 = tpu.matmul %10, %1, %cst_14 {dimension_numbers = #tpu.dot_dimension_numbers<[1], [0], [0], [1], [0, 0, 1, 1], [], []>} : vector<1x128xf32>, vector<128x128xf32>, vector<1x128xf32> -> vector<1x128xf32>
    %cst_15 = arith.constant 0.001953125 : f32
    %15 = vector.broadcast %cst_15 : f32 to vector<1x128xf32>
    %16 = arith.mulf %14, %15 : vector<1x128xf32>
    %17 = arith.mulf %13, %13 : vector<1x128xf32>
    %18 = arith.subf %16, %17 : vector<1x128xf32>
    %cst_16 = arith.constant 9.99999974E-6 : f32
    %19 = vector.broadcast %cst_16 : f32 to vector<1x128xf32>
    %20 = arith.addf %18, %19 : vector<1x128xf32>
    %21 = math.rsqrt %20 : vector<1x128xf32>
    %22 = arith.mulf %3, %21 : vector<1x128xf32>
    %23 = arith.mulf %13, %22 : vector<1x128xf32>
    %24 = arith.subf %4, %23 : vector<1x128xf32>
    %25 = vector.broadcast %22 : vector<1x128xf32> to vector<16x128xf32>
    %26 = arith.mulf %0, %25 : vector<16x128xf32>
    %27 = vector.broadcast %24 : vector<1x128xf32> to vector<16x128xf32>
    %28 = arith.addf %26, %27 : vector<16x128xf32>
    %cst_17 = arith.constant 0.000000e+00 : f32
    %29 = vector.broadcast %cst_17 : f32 to vector<16x128xf32>
    %30 = arith.minimumf %28, %29 : vector<16x128xf32>
    %31 = math.exp %30 : vector<16x128xf32>
    %cst_18 = arith.constant 1.000000e+00 : f32
    %32 = vector.broadcast %cst_18 : f32 to vector<16x128xf32>
    %33 = arith.subf %31, %32 : vector<16x128xf32>
    %cst_19 = arith.constant 1.67326319 : f32
    %34 = vector.broadcast %cst_19 : f32 to vector<16x128xf32>
    %35 = arith.mulf %34, %33 : vector<16x128xf32>
    %cst_20 = arith.constant 0.000000e+00 : f32
    %36 = vector.broadcast %cst_20 : f32 to vector<16x128xf32>
    %37 = arith.cmpf ogt, %28, %36 : vector<16x128xf32>
    %38 = arith.select %37, %28, %35 : vector<16x128xi1>, vector<16x128xf32>
    %cst_21 = arith.constant 1.05070102 : f32
    %39 = vector.broadcast %cst_21 : f32 to vector<16x128xf32>
    %40 = arith.mulf %39, %38 : vector<16x128xf32>
    %c0_22 = arith.constant 0 : index
    %c0_23 = arith.constant 0 : index
    %41 = vector.load %arg6[%c0_22, %c0_23] : memref<128x384xf32, #tpu.memory_space<vmem>>, vector<128x384xf32>
    %cst_24 = arith.constant dense<0.000000e+00> : vector<16x384xf32>
    %42 = tpu.matmul %40, %41, %cst_24 {dimension_numbers = #tpu.dot_dimension_numbers<[1], [0], [0], [1], [0, 0, 1, 1], [], []>} : vector<16x128xf32>, vector<128x384xf32>, vector<16x384xf32> -> vector<16x384xf32>
    %43 = vector.extract_strided_slice %42 {offsets = [0, 0], sizes = [16, 128], strides = [1, 1]} : vector<16x384xf32> to vector<16x128xf32>
    %44 = vector.extract_strided_slice %42 {offsets = [0, 128], sizes = [16, 128], strides = [1, 1]} : vector<16x384xf32> to vector<16x128xf32>
    %45 = vector.extract_strided_slice %42 {offsets = [0, 256], sizes = [16, 128], strides = [1, 1]} : vector<16x384xf32> to vector<16x128xf32>
    %46 = tpu.concatenate %43, %44, %45 in 0 : vector<16x128xf32>, vector<16x128xf32>, vector<16x128xf32> -> vector<48x128xf32>
    %cst_25 = arith.constant dense<0.000000e+00> : vector<16x128xf32>
    %47 = tpu.matmul %2, %46, %cst_25 {dimension_numbers = #tpu.dot_dimension_numbers<[1], [0], [0], [1], [0, 0, 1, 1], [], []>} : vector<16x48xf32>, vector<48x128xf32>, vector<16x128xf32> -> vector<16x128xf32>
    %48 = vector.broadcast %5 : vector<1x128xf32> to vector<16x128xf32>
    %49 = arith.addf %47, %48 : vector<16x128xf32>
    %c0_26 = arith.constant 0 : index
    %c0_27 = arith.constant 0 : index
    %50 = vector.load %arg8[%c0_26, %c0_27] : memref<1x128xf32, #tpu.memory_space<vmem>>, vector<1x128xf32>
    %c0_28 = arith.constant 0 : index
    %c0_29 = arith.constant 0 : index
    %51 = vector.load %arg9[%c0_28, %c0_29] : memref<1x128xf32, #tpu.memory_space<vmem>>, vector<1x128xf32>
    %c0_30 = arith.constant 0 : index
    %c0_31 = arith.constant 0 : index
    %52 = vector.load %arg11[%c0_30, %c0_31] : memref<1x128xf32, #tpu.memory_space<vmem>>, vector<1x128xf32>
    %cst_32 = arith.constant dense<0.000000e+00> : vector<128xf32>
    %53 = vector.multi_reduction <add>, %49, %cst_32 [0] : vector<16x128xf32> to vector<128xf32>
    %54 = vector.shape_cast %53 : vector<128xf32> to vector<1x128xf32>
    %55 = arith.mulf %49, %49 : vector<16x128xf32>
    %cst_33 = arith.constant dense<0.000000e+00> : vector<128xf32>
    %56 = vector.multi_reduction <add>, %55, %cst_33 [0] : vector<16x128xf32> to vector<128xf32>
    %57 = vector.shape_cast %56 : vector<128xf32> to vector<1x128xf32>
    %cst_34 = arith.constant dense<0.000000e+00> : vector<1x128xf32>
    %58 = tpu.matmul %54, %1, %cst_34 {dimension_numbers = #tpu.dot_dimension_numbers<[1], [0], [0], [1], [0, 0, 1, 1], [], []>} : vector<1x128xf32>, vector<128x128xf32>, vector<1x128xf32> -> vector<1x128xf32>
    %cst_35 = arith.constant 0.001953125 : f32
    %59 = vector.broadcast %cst_35 : f32 to vector<1x128xf32>
    %60 = arith.mulf %58, %59 : vector<1x128xf32>
    %cst_36 = arith.constant dense<0.000000e+00> : vector<1x128xf32>
    %61 = tpu.matmul %57, %1, %cst_36 {dimension_numbers = #tpu.dot_dimension_numbers<[1], [0], [0], [1], [0, 0, 1, 1], [], []>} : vector<1x128xf32>, vector<128x128xf32>, vector<1x128xf32> -> vector<1x128xf32>
    %cst_37 = arith.constant 0.001953125 : f32
    %62 = vector.broadcast %cst_37 : f32 to vector<1x128xf32>
    %63 = arith.mulf %61, %62 : vector<1x128xf32>
    %64 = arith.mulf %60, %60 : vector<1x128xf32>
    %65 = arith.subf %63, %64 : vector<1x128xf32>
    %cst_38 = arith.constant 9.99999974E-6 : f32
    %66 = vector.broadcast %cst_38 : f32 to vector<1x128xf32>
    %67 = arith.addf %65, %66 : vector<1x128xf32>
    %68 = math.rsqrt %67 : vector<1x128xf32>
    %69 = arith.mulf %50, %68 : vector<1x128xf32>
    %70 = arith.mulf %60, %69 : vector<1x128xf32>
    %71 = arith.subf %51, %70 : vector<1x128xf32>
    %72 = vector.broadcast %69 : vector<1x128xf32> to vector<16x128xf32>
    %73 = arith.mulf %49, %72 : vector<16x128xf32>
    %74 = vector.broadcast %71 : vector<1x128xf32> to vector<16x128xf32>
    %75 = arith.addf %73, %74 : vector<16x128xf32>
    %cst_39 = arith.constant 0.000000e+00 : f32
    %76 = vector.broadcast %cst_39 : f32 to vector<16x128xf32>
    %77 = arith.minimumf %75, %76 : vector<16x128xf32>
    %78 = math.exp %77 : vector<16x128xf32>
    %cst_40 = arith.constant 1.000000e+00 : f32
    %79 = vector.broadcast %cst_40 : f32 to vector<16x128xf32>
    %80 = arith.subf %78, %79 : vector<16x128xf32>
    %cst_41 = arith.constant 1.67326319 : f32
    %81 = vector.broadcast %cst_41 : f32 to vector<16x128xf32>
    %82 = arith.mulf %81, %80 : vector<16x128xf32>
    %cst_42 = arith.constant 0.000000e+00 : f32
    %83 = vector.broadcast %cst_42 : f32 to vector<16x128xf32>
    %84 = arith.cmpf ogt, %75, %83 : vector<16x128xf32>
    %85 = arith.select %84, %75, %82 : vector<16x128xi1>, vector<16x128xf32>
    %cst_43 = arith.constant 1.05070102 : f32
    %86 = vector.broadcast %cst_43 : f32 to vector<16x128xf32>
    %87 = arith.mulf %86, %85 : vector<16x128xf32>
    %c0_44 = arith.constant 0 : index
    %c0_45 = arith.constant 0 : index
    %88 = vector.load %arg10[%c0_44, %c0_45] : memref<128x384xf32, #tpu.memory_space<vmem>>, vector<128x384xf32>
    %cst_46 = arith.constant dense<0.000000e+00> : vector<16x384xf32>
    %89 = tpu.matmul %87, %88, %cst_46 {dimension_numbers = #tpu.dot_dimension_numbers<[1], [0], [0], [1], [0, 0, 1, 1], [], []>} : vector<16x128xf32>, vector<128x384xf32>, vector<16x384xf32> -> vector<16x384xf32>
    %90 = vector.extract_strided_slice %89 {offsets = [0, 0], sizes = [16, 128], strides = [1, 1]} : vector<16x384xf32> to vector<16x128xf32>
    %91 = vector.extract_strided_slice %89 {offsets = [0, 128], sizes = [16, 128], strides = [1, 1]} : vector<16x384xf32> to vector<16x128xf32>
    %92 = vector.extract_strided_slice %89 {offsets = [0, 256], sizes = [16, 128], strides = [1, 1]} : vector<16x384xf32> to vector<16x128xf32>
    %93 = tpu.concatenate %90, %91, %92 in 0 : vector<16x128xf32>, vector<16x128xf32>, vector<16x128xf32> -> vector<48x128xf32>
    %cst_47 = arith.constant dense<0.000000e+00> : vector<16x128xf32>
    %94 = tpu.matmul %2, %93, %cst_47 {dimension_numbers = #tpu.dot_dimension_numbers<[1], [0], [0], [1], [0, 0, 1, 1], [], []>} : vector<16x48xf32>, vector<48x128xf32>, vector<16x128xf32> -> vector<16x128xf32>
    %95 = vector.broadcast %52 : vector<1x128xf32> to vector<16x128xf32>
    %96 = arith.addf %94, %95 : vector<16x128xf32>
    %97 = arith.addf %96, %0 : vector<16x128xf32>
    %c0_48 = arith.constant 0 : index
    %c0_49 = arith.constant 0 : index
    %98 = vector.load %arg12[%c0_48, %c0_49] : memref<16x128xf32, #tpu.memory_space<vmem>>, vector<16x128xf32>
    tpu.vector_store %arg12[%c0_48, %c0_49], %97 {strides = array<i32>} : memref<16x128xf32, #tpu.memory_space<vmem>>, vector<16x128xf32>,
    return
  }
  func.func @transform_0(%arg0: i32) -> (i32, i32) {
    %c0_i32 = arith.constant 0 : i32
    %c0_i32_0 = arith.constant 0 : i32
    %c0_i32_1 = arith.constant 0 : i32
    return %c0_i32, %c0_i32_0 : i32, i32
  }
  func.func @transform_1(%arg0: i32) -> (i32, i32) {
    %c0_i32 = arith.constant 0 : i32
    %c0_i32_0 = arith.constant 0 : i32
    %c0_i32_1 = arith.constant 0 : i32
    return %c0_i32, %c0_i32_0 : i32, i32
  }
  func.func @transform_2(%arg0: i32) -> (i32, i32) {
    %c0_i32 = arith.constant 0 : i32
    %c0_i32_0 = arith.constant 0 : i32
    %c0_i32_1 = arith.constant 0 : i32
    return %c0_i32, %c0_i32_0 : i32, i32
  }
  func.func @transform_3(%arg0: i32) -> (i32, i32) {
    %c0_i32 = arith.constant 0 : i32
    %c0_i32_0 = arith.constant 0 : i32
    %c0_i32_1 = arith.constant 0 : i32
    return %c0_i32, %c0_i32_0 : i32, i32
  }
  func.func @transform_4(%arg0: i32) -> (i32, i32) {
    %c0_i32 = arith.constant 0 : i32
    %c0_i32_0 = arith.constant 0 : i32
    %c0_i32_1 = arith.constant 0 : i32
    return %c0_i32, %c0_i32_0 : i32, i32
  }
  func.func @transform_5(%arg0: i32) -> (i32, i32) {
    %c0_i32 = arith.constant 0 : i32
    %c0_i32_0 = arith.constant 0 : i32
    %c0_i32_1 = arith.constant 0 : i32
    return %c0_i32, %c0_i32_0 : i32, i32
  }
  func.func @transform_6(%arg0: i32) -> (i32, i32) {
    %c0_i32 = arith.constant 0 : i32
    %c0_i32_0 = arith.constant 0 : i32
    %c0_i32_1 = arith.constant 0 : i32
    return %c0_i32, %c0_i32_0 : i32, i32
  }
  func.func @transform_7(%arg0: i32) -> (i32, i32) {
    %c0_i32 = arith.constant 0 : i32
    %c0_i32_0 = arith.constant 0 : i32
    %c0_i32_1 = arith.constant 0 : i32
    return %c0_i32, %c0_i32_0 : i32, i32
  }
  func.func @transform_8(%arg0: i32) -> (i32, i32) {
    %c0_i32 = arith.constant 0 : i32
    %c0_i32_0 = arith.constant 0 : i32
    %c0_i32_1 = arith.constant 0 : i32
    return %c0_i32, %c0_i32_0 : i32, i32
  }
  func.func @transform_9(%arg0: i32) -> (i32, i32) {
    %c0_i32 = arith.constant 0 : i32
    %c0_i32_0 = arith.constant 0 : i32
    %c0_i32_1 = arith.constant 0 : i32
    return %c0_i32, %c0_i32_0 : i32, i32
  }
  func.func @transform_10(%arg0: i32) -> (i32, i32) {
    %c0_i32 = arith.constant 0 : i32
    %c0_i32_0 = arith.constant 0 : i32
    %c0_i32_1 = arith.constant 0 : i32
    return %c0_i32, %c0_i32_0 : i32, i32
  }
  func.func @transform_11(%arg0: i32) -> (i32, i32) {
    %c0_i32 = arith.constant 0 : i32
    %c0_i32_0 = arith.constant 0 : i32
    %c0_i32_1 = arith.constant 0 : i32
    return %c0_i32, %c0_i32_0 : i32, i32
  }
}

</mosaic_0001>

<bundles_post_ra>
// kernel: tpu_custom_call.1
= control target key start
LH: loop header
LB: loop body
LE: loop exit
PB: predicated region body
PF: predicated region fallthrough
CT: control target
= control target key end

     0   :  { %16 = vsyncpa [#allocation3], 0  ;;  %s2233_s0 = inlined_call_operand.hbm [shape: f32[16,128], index: 0, kind: input, shape index: {}]   ;;  %s2234_s1 = inlined_call_operand.hbm [shape: f32[128,128], index: 1, kind: input, shape index: {}]   ;;  %s2235_s2 = inlined_call_operand.hbm [shape: f32[16,48], index: 2, kind: input, shape index: {}]   ;;  %s2236_s3 = inlined_call_operand.vmem [shape: f32[1,128], index: 3, kind: input, shape index: {}]   ;;  %s2237_s4 = inlined_call_operand.vmem [shape: f32[1,128], index: 4, kind: input, shape index: {}]   ;;  %s2238_s5 = inlined_call_operand.hbm [shape: f32[128,384], index: 5, kind: input, shape index: {}]   ;;  %s2239_s6 = inlined_call_operand.vmem [shape: f32[1,128], index: 6, kind: input, shape index: {}]   ;;  %s2240_s7 = inlined_call_operand.vmem [shape: f32[1,128], index: 7, kind: input, shape index: {}]   ;;  %s2241_s8 = inlined_call_operand.vmem [shape: f32[1,128], index: 8, kind: input, shape index: {}]   ;;  %s2242_s9 = inlined_call_operand.hbm [shape: f32[128,384], index: 9, kind: input, shape index: {}]   ;;  %s2243_s10 = inlined_call_operand.vmem [shape: f32[1,128], index: 10, kind: input, shape index: {}]   ;;  %s2244_s11 = inlined_call_operand.hbm [shape: f32[16,128], index: 11, kind: output, shape index: {}]  }
   0x1   :  { %17 = vsyncpa [#allocation6], 0 }
   0x2   :  { %18 = vsyncpa [#allocation9], 0 }
   0x3   :  { %19 = vsyncpa [#allocation4], 0  ;;  %s1902_s17 = smov [#allocation5]   ;;  %s1903_s19 = smov [#allocation8]  }
   0x4   :  { %s37_s18 = sshll.u32 %s1902_s17, 4  ;;  %s65_s20 = sshll.u32 %s1903_s19, 4  ;;  %s38_s18 = int_to_ptr.vmem [resolvable:$true] %s37_s18  ;;  %s1975_s20 = int_to_ptr.vmem [resolvable:$true] %s65_s20 }
   0x5   :  { %s1762_s23 = scalar_lea.hbm %s2234_s1, 2048 }
   0x6   :  { %p1763_p0 = scmp.ne.s32.totalorder %s2234_s1, %s1762_s23  ;;  %p1766_p1 = scmp.lt.u32.totalorder %s1762_s23, %s2234_s1 }
   0x8   :  { %p1768_p2 = pnand %p1766_p1, %p1763_p0 }
   0xa   :  { %1771 = shalt.err (!%p1768_p2)
}
   0xb   :  { %s1772_s28 = scalar_lea.vmem %s38_s18, 2048  ;;  %p1777_p4 = scmp.lt.s32.totalorder %s38_s18, %s38_s18 }
   0xc   :  { %p1773_p3 = scmp.ne.s32.totalorder %s38_s18, %s1772_s28  ;;  %p1778_p5 = scmp.lt.s32.totalorder %s1772_s28, %s1772_s28 }
   0xe   :  { %p1779_p6 = por %p1778_p5, %p1777_p4 }
  0x10   :  { %p1780_p7 = pnand %p1779_p6, %p1773_p3 }
  0x12   :  { %1783 = shalt.err (!%p1780_p7)
}
  0x13   :  { %s1904_s29 = smov 128   ;;  %s1905_s30 = smov 8  }
  0x14   :  { %43 = dma.hbm_to_vmem [thread:$0]  %s2234_s1, 2048, %s38_s18, [#allocation6], %s1904_s29, %s1904_s29, %s1905_s30  }
  0x15   :  { %s1784_s16 = scalar_lea.hbm %s2238_s5, 6144 }
  0x16   :  { %p1785_p8 = scmp.ne.s32.totalorder %s2238_s5, %s1784_s16  ;;  %p1788_p9 = scmp.lt.u32.totalorder %s1784_s16, %s2238_s5 }
  0x18   :  { %p1790_p10 = pnand %p1788_p9, %p1785_p8 }
  0x1a   :  { %1793 = shalt.err (!%p1790_p10)
}
  0x1b   :  { %s1794_s23 = scalar_lea.vmem %s1975_s20, 6144  ;;  %p1799_p12 = scmp.lt.s32.totalorder %s1975_s20, %s1975_s20 }
  0x1c   :  { %p1795_p11 = scmp.ne.s32.totalorder %s1975_s20, %s1794_s23  ;;  %p1800_p13 = scmp.lt.s32.totalorder %s1794_s23, %s1794_s23 }
  0x1e   :  { %p1801_p0 = por %p1800_p13, %p1799_p12 }
  0x20   :  { %p1802_p1 = pnand %p1801_p0, %p1795_p11 }
  0x22   :  { %1805 = shalt.err (!%p1802_p1)
}
  0x23   :  { %s1906_s1 = smov 384   ;;  %s1907_s18 = smov 24  }
  0x24   :  { %71 = dma.hbm_to_vmem [thread:$0]  %s2238_s5, 6144, %s1975_s20, [#allocation9], %s1906_s1, %s1906_s1, %s1907_s18  }
  0x25   :  { %s1908_s26 = smov [#allocation2]   ;;  %s1909_s28 = smov [#allocation7]  }
  0x26   :  { %s25_s27 = sshll.u32 %s1908_s26, 4  ;;  %s49_s12 = sshll.u32 %s1909_s28, 4  ;;  %s26_s27 = int_to_ptr.vmem [resolvable:$true] %s25_s27  ;;  %s2012_s12 = int_to_ptr.vmem [resolvable:$true] %s49_s12 }
  0x27   :  { %s1806_s15 = scalar_lea.hbm %s2233_s0, 256 }
  0x28   :  { %p1807_p2 = scmp.ne.s32.totalorder %s2233_s0, %s1806_s15  ;;  %p1810_p3 = scmp.lt.u32.totalorder %s1806_s15, %s2233_s0 }
  0x2a   :  { %p1812_p4 = pnand %p1810_p3, %p1807_p2 }
  0x2c   :  { %1815 = shalt.err (!%p1812_p4)
}
  0x2d   :  { %s1816_s5 = scalar_lea.vmem %s26_s27, 256  ;;  %p1821_p6 = scmp.lt.s32.totalorder %s26_s27, %s26_s27 }
  0x2e   :  { %p1817_p5 = scmp.ne.s32.totalorder %s26_s27, %s1816_s5  ;;  %p1822_p7 = scmp.lt.s32.totalorder %s1816_s5, %s1816_s5 }
  0x30   :  { %p1823_p8 = por %p1822_p7, %p1821_p6 }
  0x32   :  { %p1824_p9 = pnand %p1823_p8, %p1817_p5 }
  0x34   :  { %1827 = shalt.err (!%p1824_p9)
}
  0x35   :  { %31 = dma.hbm_to_vmem [thread:$0]  %s2233_s0, 256, %s26_s27, [#allocation3], %s1904_s29, %s1904_s29, %s1905_s30  }
  0x36   :  { %s1828_s25 = scalar_lea.hbm %s2235_s2, 256 }
  0x37   :  { %p1829_p10 = scmp.ne.s32.totalorder %s2235_s2, %s1828_s25  ;;  %p1832_p11 = scmp.lt.u32.totalorder %s1828_s25, %s2235_s2 }
  0x39   :  { %p1834_p12 = pnand %p1832_p11, %p1829_p10 }
  0x3b   :  { %1837 = shalt.err (!%p1834_p12)
}
  0x3c   :  { %s1838_s15 = scalar_lea.vmem %s2012_s12, 256  ;;  %p1843_p0 = scmp.lt.s32.totalorder %s2012_s12, %s2012_s12 }
  0x3d   :  { %p1839_p13 = scmp.ne.s32.totalorder %s2012_s12, %s1838_s15  ;;  %p1844_p1 = scmp.lt.s32.totalorder %s1838_s15, %s1838_s15 }
  0x3f   :  { %p1845_p2 = por %p1844_p1, %p1843_p0 }
  0x41   :  { %p1846_p3 = pnand %p1845_p2, %p1839_p13 }
  0x43   :  { %1849 = shalt.err (!%p1846_p3)
}
  0x44   :  { %55 = dma.hbm_to_vmem [thread:$0]  %s2235_s2, 256, %s2012_s12, [#allocation6], %s1904_s29, %s1904_s29, %s1905_s30  }
  0x45   :  { %s1910_s16 = smov [#allocation10]   ;;  %s1850_s5 = scalar_lea.hbm %s2242_s9, 6144 }
  0x46   :  { %s83_s17 = sshll.u32 %s1910_s16, 4  ;;  %p1851_p4 = scmp.ne.s32.totalorder %s2242_s9, %s1850_s5  ;;  %s84_s17 = int_to_ptr.vmem [resolvable:$true] %s83_s17 }
  0x47   :  { %p1854_p5 = scmp.lt.u32.totalorder %s1850_s5, %s2242_s9 }
  0x49   :  { %p1856_p6 = pnand %p1854_p5, %p1851_p4 }
  0x4b   :  { %1859 = shalt.err (!%p1856_p6)
}
  0x4c   :  { %s1860_s25 = scalar_lea.vmem %s84_s17, 6144  ;;  %p1865_p8 = scmp.lt.s32.totalorder %s84_s17, %s84_s17 }
  0x4d   :  { %p1861_p7 = scmp.ne.s32.totalorder %s84_s17, %s1860_s25  ;;  %p1866_p9 = scmp.lt.s32.totalorder %s1860_s25, %s1860_s25 }
  0x4f   :  { %p1867_p10 = por %p1866_p9, %p1865_p8 }
  0x51   :  { %p1868_p11 = pnand %p1867_p10, %p1861_p7 }
  0x53   :  { %1871 = shalt.err (!%p1868_p11)
}
  0x54   :  { %89 = dma.hbm_to_vmem [thread:$0]  %s2242_s9, 6144, %s84_s17, [#allocation9], %s1906_s1, %s1906_s1, %s1907_s18  }
  0x55   :  { %1894 = dma.done.wait [#allocation3], 256  }
  0x56   :  { %1895 = vsyncadd [#allocation3], 4294967040 }
  0x57   :  { %1896 = dma.done.wait [#allocation6], 2304  }
  0x58   :  { %1897 = vsyncadd [#allocation6], 4294964992 }
  0x59   :  { %1898 = dma.done.wait [#allocation9], 12288  }
  0x5a   :  { %1899 = vsyncadd [#allocation9], 4294955008  ;;  %v1911_v0 = vmov 0.0|0.0   ;;  %vm1912_vm0 = vmmov 0   ;;  %v1913_v1 = vmov 0.0   ;;  %v109_v2 = vld [vmem:[#allocation5] sm:$0xff] }
  0x5b   :  { %1489 = vmatprep.subr.bf16.mxu0 %v1911_v0  ;;  %1513 = vmatprep.subr.bf16.mxu1 %v1911_v0  ;;  %v110_v3 = vld [vmem:[#allocation5 + $0x8] sm:$0xff]  ;;  %v111_v4 = vld [vmem:[#allocation5 + $0x10] sm:$0xff]  ;;  %v112_v6 = vld [vmem:[#allocation5 + $0x18] sm:$0xff]  ;;  %vm533_vm3 = vcmask 392192   ;;  %s1914_s15 = smov [#allocation11]  }
  0x5c   :  { %1281 = vmatprep.mubr.msk.f32.mxu0 %vm1912_vm0, %v1913_v1  ;;  %1316 = vmatprep.mubr.msk.f32.mxu1 %vm1912_vm0, %v1913_v1  ;;  %v2070_v5 = vpack.c.bf16 %v110_v3, %v109_v2  ;;  %v2074_v7 = vpack.c.bf16 %v112_v6, %v111_v4  ;;  %v113_v8 = vld [vmem:[#allocation5 + $0x20] sm:$0xff]  ;;  %v114_v9 = vld [vmem:[#allocation5 + $0x28] sm:$0xff]  ;;  %v2078_v10 = vld [vmem:[#allocation2] sm:$0xff]  ;;  %s1105_s0 = sshll.u32 %s1914_s15, 4  ;;  %s1106_s0 = int_to_ptr.vmem [resolvable:$true] %s1105_s0 }
  0x5d   :  { %v2080_v11 = vld [vmem:[#allocation2 + $0x8] sm:$0xff]  ;;  %v137_v13 = vmul.f32 %v2078_v10, %v2078_v10  ;;  %v2090_v15 = vpack.c.bf16 %v114_v9, %v113_v8  ;;  %v115_v16 = vld [vmem:[#allocation5 + $0x30] sm:$0xff]  ;;  %v117_v22 = vld [vmem:[#allocation5 + $0x40] sm:$0xff]  ;;  %s1872_s27 = scalar_lea.vmem %s1106_s0, 256  ;;  %p1877_p13 = scmp.lt.s32.totalorder %s1106_s0, %s1106_s0 }
  0x5e   :  { %1491 = vmatpush3.bf16.msra.mxu0 %v2070_v5  ;;  %1515 = vmatpush3.bf16.msra.mxu1 %v2070_v5  ;;  %v130_v12 = vadd.f32 %v2080_v11, %v2078_v10  ;;  %v138_v14 = vmul.f32 %v2080_v11, %v2080_v11  ;;  %v116_v17 = vld [vmem:[#allocation5 + $0x38] sm:$0xff]  ;;  %v118_v23 = vld [vmem:[#allocation5 + $0x48] sm:$0xff]  ;;  %v119_v27 = vld [vmem:[#allocation5 + $0x50] sm:$0xff]  ;;  %p1873_p12 = scmp.ne.s32.totalorder %s1106_s0, %s1872_s27  ;;  %p1878_p0 = scmp.lt.s32.totalorder %s1872_s27, %s1872_s27 }
  0x5f   :  { %1492 = vmatprep.subr.bf16.mxu0 %v1911_v0  ;;  %1516 = vmatprep.subr.bf16.mxu1 %v1911_v0  ;;  %v2096_v21 = vpack.c.bf16 %v116_v17, %v115_v16  ;;  %v2102_v26 = vpack.c.bf16 %v118_v23, %v117_v22  ;;  %v120_v28 = vld [vmem:[#allocation5 + $0x58] sm:$0xff]  ;;  %v121_v32 = vld [vmem:[#allocation5 + $0x60] sm:$0xff]  ;;  %v122_v33 = vld [vmem:[#allocation5 + $0x68] sm:$0xff] }
  0x60   :  { %v139_v18 = vadd.f32 %v138_v14, %v137_v13  ;;  %v131_v19 = vrot.slane %v130_v12, 4  ;;  %v2108_v31 = vpack.c.bf16 %v120_v28, %v119_v27  ;;  %v2114_v36 = vpack.c.bf16 %v122_v33, %v121_v32  ;;  %v123_v37 = vld [vmem:[#allocation5 + $0x70] sm:$0xff]  ;;  %v124_v38 = vld [vmem:[#allocation5 + $0x78] sm:$0xff]  ;;  %v330_v48 = vld [vmem:[#allocation8 + $0x18] sm:$0xff]  ;;  %p1879_p1 = por %p1878_p0, %p1877_p13 }
  0x61   :  { %v2120_v41 = vpack.c.bf16 %v124_v38, %v123_v37  ;;  %v328_v44 = vld [vmem:[#allocation8 + $0x8] sm:$0xff]  ;;  %v331_v45 = vld [vmem:[#allocation8 + $0x20] sm:$0xff]  ;;  %v329_v49 = vld [vmem:[#allocation8 + $0x10] sm:$0xff] }
  0x62   :  { %1494 = vmatpush3.bf16.msra.mxu0 %v2074_v7  ;;  %1518 = vmatpush3.bf16.msra.mxu1 %v2074_v7  ;;  %v140_v20 = vrot.slane %v139_v18, 4  ;;  %v132_v24 = vadd.f32 %v131_v19, %v130_v12  ;;  %v1537_v46 = vpack.c.bf16 %v331_v45, %v328_v44  ;;  %v327_v47 = vld [vmem:[#allocation8] sm:$0xff]  ;;  %v332_v51 = vld [vmem:[#allocation8 + $0x28] sm:$0xff]  ;;  %v334_v53 = vld [vmem:[#allocation8 + $0x38] sm:$0xff]  ;;  %p1880_p2 = pnand %p1879_p1, %p1873_p12 }
  0x63   :  { %1495 = vmatprep.subr.bf16.mxu0 %v1911_v0  ;;  %1519 = vmatprep.subr.bf16.mxu1 %v1911_v0  ;;  %v1539_v50 = vpack.c.bf16 %v330_v48, %v327_v47  ;;  %v1569_v52 = vpack.c.bf16 %v332_v51, %v329_v49  ;;  %v337_v54 = vld [vmem:[#allocation8 + $0x50] sm:$0xff]  ;;  %v336_v57 = vld [vmem:[#allocation8 + $0x48] sm:$0xff]  ;;  %v335_v58 = vld [vmem:[#allocation8 + $0x40] sm:$0xff] }
  0x64   :  { %v141_v25 = vadd.f32 %v140_v20, %v139_v18  ;;  %v133_v29 = vrot.slane %v132_v24, 2  ;;  %v1541_v55 = vpack.c.bf16 %v337_v54, %v334_v53  ;;  %v333_v56 = vld [vmem:[#allocation8 + $0x30] sm:$0xff]  ;;  %v338_v60 = vld [vmem:[#allocation8 + $0x58] sm:$0xff]  ;;  %v340_v61 = vld [vmem:[#allocation8 + $0x68] sm:$0xff] }
  0x65   :  { %v1543_v59 = vpack.c.bf16 %v336_v57, %v333_v56  ;;  %v343_v62 = vld [vmem:[#allocation8 + $0x80] sm:$0xff]  ;;  %v1573_v63 = vpack.c.bf16 %v338_v60, %v335_v58  ;;  %v342_v4 = vld [vmem:[#allocation8 + $0x78] sm:$0xff]  ;;  %v341_v6 = vld [vmem:[#allocation8 + $0x70] sm:$0xff] }
  0x66   :  { %1497 = vmatpush3.bf16.msra.mxu0 %v2090_v15  ;;  %1521 = vmatpush3.bf16.msra.mxu1 %v2090_v15  ;;  %v142_v30 = vrot.slane %v141_v25, 2  ;;  %v134_v34 = vadd.f32 %v133_v29, %v132_v24  ;;  %v1545_v2 = vpack.c.bf16 %v343_v62, %v340_v61  ;;  %v339_v3 = vld [vmem:[#allocation8 + $0x60] sm:$0xff]  ;;  %v344_v9 = vld [vmem:[#allocation8 + $0x88] sm:$0xff]  ;;  %v346_v12 = vld [vmem:[#allocation8 + $0x98] sm:$0xff] }
  0x67   :  { %1498 = vmatprep.subr.bf16.mxu0 %v1911_v0  ;;  %1522 = vmatprep.subr.bf16.mxu1 %v1911_v0  ;;  %v1547_v8 = vpack.c.bf16 %v342_v4, %v339_v3  ;;  %v349_v13 = vld [vmem:[#allocation8 + $0xb0] sm:$0xff]  ;;  %v1577_v14 = vpack.c.bf16 %v344_v9, %v341_v6  ;;  %v348_v18 = vld [vmem:[#allocation8 + $0xa8] sm:$0xff]  ;;  %v347_v19 = vld [vmem:[#allocation8 + $0xa0] sm:$0xff] }
  0x68   :  { %v143_v35 = vadd.f32 %v142_v30, %v141_v25  ;;  %v135_v39 = vrot.slane %v134_v34, 1  ;;  %v1549_v16 = vpack.c.bf16 %v349_v13, %v346_v12  ;;  %v345_v17 = vld [vmem:[#allocation8 + $0x90] sm:$0xff]  ;;  %v350_v20 = vld [vmem:[#allocation8 + $0xb8] sm:$0xff]  ;;  %v352_v22 = vld [vmem:[#allocation8 + $0xc8] sm:$0xff] }
  0x69   :  { %v355_v23 = vld [vmem:[#allocation8 + $0xe0] sm:$0xff]  ;;  %v1581_v24 = vpack.c.bf16 %v350_v20, %v347_v19  ;;  %v1551_v25 = vpack.c.bf16 %v348_v18, %v345_v17  ;;  %v353_v27 = vld [vmem:[#allocation8 + $0xd0] sm:$0xff]  ;;  %v356_v28 = vld [vmem:[#allocation8 + $0xe8] sm:$0xff] }
  0x6a   :  { %1500 = vmatpush3.bf16.msra.mxu0 %v2096_v21  ;;  %1524 = vmatpush3.bf16.msra.mxu1 %v2096_v21  ;;  %v144_v40 = vrot.slane %v143_v35, 1  ;;  %v136_v42 = vadd.f32 %v135_v39, %v134_v34  ;;  %v1553_v29 = vpack.c.bf16 %v355_v23, %v352_v22  ;;  %v351_v30 = vld [vmem:[#allocation8 + $0xc0] sm:$0xff]  ;;  %v354_v32 = vld [vmem:[#allocation8 + $0xd8] sm:$0xff]  ;;  %v361_v34 = vld [vmem:[#allocation8 + $0x110] sm:$0xff] }
  0x6b   :  { %1501 = vmatprep.subr.bf16.mxu0 %v1911_v0  ;;  %1525 = vmatprep.subr.bf16.mxu1 %v1911_v0  ;;  %v358_v33 = vld [vmem:[#allocation8 + $0xf8] sm:$0xff]  ;;  %v1555_v37 = vpack.c.bf16 %v354_v32, %v351_v30  ;;  %v359_v38 = vld [vmem:[#allocation8 + $0x100] sm:$0xff]  ;;  %v364_v44 = vld [vmem:[#allocation8 + $0x128] sm:$0xff] }
  0x6c   :  { %v145_v43 = vadd.f32 %v144_v40, %v143_v35  ;;  %v1585_v35 = vpack.c.bf16 %v356_v28, %v353_v27  ;;  %v362_v39 = vld [vmem:[#allocation8 + $0x118] sm:$0xff]  ;;  %v1557_v40 = vpack.c.bf16 %v361_v34, %v358_v33  ;;  %v367_v45 = vld [vmem:[#allocation8 + $0x140] sm:$0xff]  ;;  %v365_v48 = vld [vmem:[#allocation8 + $0x130] sm:$0xff] }
  0x6d   :  { %v368_v49 = vld [vmem:[#allocation8 + $0x148] sm:$0xff]  ;;  %v363_v51 = vld [vmem:[#allocation8 + $0x120] sm:$0xff]  ;;  %v370_v53 = vld [vmem:[#allocation8 + $0x158] sm:$0xff] }
  0x6e   :  { %1503 = vmatpush3.bf16.msra.mxu0 %v2102_v26  ;;  %1527 = vmatpush3.bf16.msra.mxu1 %v2102_v26  ;;  %v373_v54 = vld [vmem:[#allocation8 + $0x170] sm:$0xff]  ;;  %v371_v57 = vld [vmem:[#allocation8 + $0x160] sm:$0xff]  ;;  %v374_v58 = vld [vmem:[#allocation8 + $0x178] sm:$0xff] }
  0x6f   :  { %1504 = vmatprep.subr.bf16.mxu0 %v1911_v0  ;;  %1528 = vmatprep.subr.bf16.mxu1 %v1911_v0  ;;  %v369_v60 = vld [vmem:[#allocation8 + $0x150] sm:$0xff]  ;;  %v372_v61 = vld [vmem:[#allocation8 + $0x168] sm:$0xff]  ;;  %v1597_v62 = vpack.c.bf16 %v374_v58, %v371_v57  ;;  %v127_v18 = vld [vmem:[%s2236_s3] sm:$0x1] }
  0x70   :  { %v128_v23 = vld [vmem:[%s2237_s4] sm:$0x1] }
  0x72   :  { %1506 = vmatpush3.bf16.msra.mxu0 %v2108_v31  ;;  %1530 = vmatpush3.bf16.msra.mxu1 %v2108_v31 }
  0x73   :  { %1507 = vmatprep.subr.bf16.mxu0 %v1911_v0  ;;  %1531 = vmatprep.subr.bf16.mxu1 %v1911_v0 }
  0x76   :  { %1509 = vmatpush3.bf16.msra.mxu0 %v2114_v36  ;;  %1533 = vmatpush3.bf16.msra.mxu1 %v2114_v36 }
  0x77   :  { %1510 = vmatprep.subr.bf16.mxu0 %v1911_v0  ;;  %1534 = vmatprep.subr.bf16.mxu1 %v1911_v0 }
  0x7a   :  { %1512 = vmatpush3.bf16.msra.mxu0 %v2120_v41  ;;  %1536 = vmatpush3.bf16.msra.mxu1 %v2120_v41 }
  0x7b   :  { %1538 = vmatprep.subr.bf16.mxu0 %v1537_v46  ;;  %1570 = vmatprep.subr.bf16.mxu1 %v1569_v52  ;;  %v1589_v46 = vpack.c.bf16 %v362_v39, %v359_v38 }
  0x7d   :  { %1282 = vmatmul.mubr.f32.vlgmr.msra.gmra.mrb[0].mxu0 %v136_v42  ;;  %1317 = vmatmul.mubr.f32.vlgmr.msra.gmra.mrb[0].mxu1 %v145_v43  ;;  %v357_v42 = vld [vmem:[#allocation8 + $0xf0] sm:$0xff]  ;;  %v360_v43 = vld [vmem:[#allocation8 + $0x108] sm:$0xff] }
  0x7e   :  { %439 = vmatprep.mubr.f32.mxu0 %v1913_v1  ;;  %1540 = vmatpush1.bf16.msra.mxu0 %v1539_v50  ;;  %v1559_v47 = vpack.c.bf16 %v360_v43, %v357_v42  ;;  %v1561_v50 = vpack.c.bf16 %v367_v45, %v364_v44 }
  0x7f   :  { %1572 = vmatpush3.bf16.msra.mxu1 %v1569_v52  ;;  %1542 = vmatprep.subr.bf16.mxu0 %v1541_v55  ;;  %v366_v52 = vld [vmem:[#allocation8 + $0x138] sm:$0xff]  ;;  %v1593_v55 = vpack.c.bf16 %v368_v49, %v365_v48 }
  0x80   :  { %1574 = vmatprep.subr.bf16.mxu1 %v1573_v63  ;;  %v1563_v56 = vpack.c.bf16 %v366_v52, %v363_v51 }
  0x82   :  { %1544 = vmatpush1.bf16.msra.mxu0 %v1543_v59  ;;  %v1565_v59 = vpack.c.bf16 %v373_v54, %v370_v53 }
  0x83   :  { %1546 = vmatprep.subr.bf16.mxu0 %v1545_v2  ;;  %1576 = vmatpush3.bf16.msra.mxu1 %v1573_v63  ;;  %v1567_v63 = vpack.c.bf16 %v372_v61, %v369_v60  ;;  %v2162_v60 = vld [vmem:[#allocation7 + $0x8] sm:$0xff] }
  0x84   :  { %1578 = vmatprep.subr.bf16.mxu1 %v1577_v14 }
  0x86   :  { %1548 = vmatpush1.bf16.msra.mxu0 %v1547_v8 }
  0x87   :  { %1550 = vmatprep.subr.bf16.mxu0 %v1549_v16  ;;  %1580 = vmatpush3.bf16.msra.mxu1 %v1577_v14  ;;  %v296_v16 = vlaneseq }
  0x88   :  { %1582 = vmatprep.subr.bf16.mxu1 %v1581_v24 }
  0x89   :  { %v297_v17 = vshrl.u32 %v296_v16, 7  ;;  %v816_v16 = vld [vmem:[#allocation10 + $0x8] sm:$0xff] }
  0x8a   :  { %1552 = vmatpush1.bf16.msra.mxu0 %v1551_v25 }
  0x8b   :  { %1554 = vmatprep.subr.bf16.mxu0 %v1553_v29  ;;  %1584 = vmatpush3.bf16.msra.mxu1 %v1581_v24  ;;  %v2131_v19 = vsub.s32 0, %v297_v17  ;;  %v819_v17 = vld [vmem:[#allocation10 + $0x20] sm:$0xff] }
  0x8c   :  { %1586 = vmatprep.subr.bf16.mxu1 %v1585_v35 }
  0x8e   :  { %1556 = vmatpush1.bf16.msra.mxu0 %v1555_v37 }
  0x8f   :  { %1558 = vmatprep.subr.bf16.mxu0 %v1557_v40  ;;  %1588 = vmatpush3.bf16.msra.mxu1 %v1585_v35 }
  0x90   :  { %1590 = vmatprep.subr.bf16.mxu1 %v1589_v46 }
  0x92   :  { %1560 = vmatpush1.bf16.msra.mxu0 %v1559_v47 }
  0x93   :  { %1562 = vmatprep.subr.bf16.mxu0 %v1561_v50  ;;  %1592 = vmatpush3.bf16.msra.mxu1 %v1589_v46  ;;  %v2158_v50 = vld [vmem:[#allocation7] sm:$0xff] }
  0x94   :  { %1594 = vmatprep.subr.bf16.mxu1 %v1593_v55 }
  0x96   :  { %1564 = vmatpush1.bf16.msra.mxu0 %v1563_v56 }
  0x97   :  { %1566 = vmatprep.subr.bf16.mxu0 %v1565_v59  ;;  %1596 = vmatpush3.bf16.msra.mxu1 %v1593_v55 }
  0x98   :  { %1598 = vmatprep.subr.bf16.mxu1 %v1597_v62 }
  0x9a   :  { %1568 = vmatpush1.bf16.msra.mxu0 %v1567_v63 }
  0x9b   :  { %1600 = vmatpush3.bf16.msra.mxu1 %v1597_v62 }
  0x9c   :  { %1613 = vmatprep.subr.bf16.mxu1 %v1911_v0 }
 0x150   :  { %v212_v2 = vpop.f32.mrb[0].mxu0  ;;  %v283_v3 = vpop.f32.mrb[0].mxu1 }
 0x151   :  { %v216_v4 = vmul.f32 0.001953125, %v212_v2  ;;  %v1283_v6 = vpop.f32.mrb[1].mxu0  ;;  %v287_v8 = vmul.f32 0.001953125, %v283_v3  ;;  %v1318_v9 = vpop.f32.mrb[1].mxu1 }
 0x153   :  { %v288_v12 = vmul.f32 %v216_v4, %v216_v4 }
 0x155   :  { %v289_v13 = vsub.f32 %v287_v8, %v288_v12 }
 0x157   :  { %v290_v14 = vadd.f32 1e-05, %v289_v13 }
 0x159   :  { %1750 = vrsqrt.f32 %v290_v14 }
 0x163   :  { %v1751_v20 = vpop.eup %1750 }
 0x164   :  { %v292_v22 = vmul.f32 %v1751_v20, %v127_v18  ;;  %v1661_v18 = vpack.c.bf16 %v819_v17, %v816_v16  ;;  %v815_v20 = vld [vmem:[#allocation10] sm:$0xff]  ;;  %v853_v16 = vld [vmem:[#allocation10 + $0x130] sm:$0xff]  ;;  %v856_v17 = vld [vmem:[#allocation10 + $0x148] sm:$0xff] }
 0x166   :  { %v293_v24 = vmul.f32 %v292_v22, %v216_v4  ;;  %v299_v25 = vrot.slane %v292_v22, %v2131_v19  ;;  %v818_v22 = vld [vmem:[#allocation10 + $0x18] sm:$0xff] }
 0x168   :  { %v294_v27 = vsub.f32 %v128_v23, %v293_v24  ;;  %v301_v28 = vmul.f32 %v299_v25, %v2078_v10  ;;  %v302_v30 = vmul.f32 %v299_v25, %v2080_v11  ;;  %v817_v23 = vld [vmem:[#allocation10 + $0x10] sm:$0xff]  ;;  %v1663_v24 = vpack.c.bf16 %v818_v22, %v815_v20  ;;  %v820_v25 = vld [vmem:[#allocation10 + $0x28] sm:$0xff]  ;;  %v851_v20 = vld [vmem:[#allocation10 + $0x120] sm:$0xff] }
 0x169   :  { %v854_v22 = vld [vmem:[#allocation10 + $0x138] sm:$0xff] }
 0x16a   :  { %v307_v29 = vrot.slane %v294_v27, %v2131_v19  ;;  %v1693_v27 = vpack.c.bf16 %v820_v25, %v817_v23  ;;  %v858_v23 = vld [vmem:[#allocation10 + $0x158] sm:$0xff]  ;;  %v1717_v25 = vpack.c.bf16 %v856_v17, %v853_v16 }
 0x16c   :  { %v309_v32 = vadd.f32 %v307_v29, %v301_v28  ;;  %v310_v33 = vadd.f32 %v307_v29, %v302_v30  ;;  %v822_v28 = vld [vmem:[#allocation10 + $0x38] sm:$0xff]  ;;  %v825_v29 = vld [vmem:[#allocation10 + $0x50] sm:$0xff] }
 0x16d   :  { %v821_v30 = vld [vmem:[#allocation10 + $0x30] sm:$0xff] }
 0x16e   :  { %v311_v34 = vmin.f32 %v309_v32, 0.0  ;;  %v312_v35 = vmin.f32 %v310_v33, 0.0  ;;  %vm321_vm1 = vcmp.gt.f32.partialorder %v309_v32, 0.0  ;;  %vm322_vm2 = vcmp.gt.f32.partialorder %v310_v33, 0.0 }
 0x170   :  { %v313_v37 = vmul.f32 1.442695, %v311_v34  ;;  %v315_v38 = vmul.f32 1.442695, %v312_v35  ;;  %v823_v34 = vld [vmem:[#allocation10 + $0x40] sm:$0xff]  ;;  %v826_v35 = vld [vmem:[#allocation10 + $0x58] sm:$0xff] }
 0x172   :  { %1752 = vpow2.f32 %v313_v37 }
 0x173   :  { %1754 = vpow2.f32 %v315_v38  ;;  %v1697_v38 = vpack.c.bf16 %v826_v35, %v823_v34 }
 0x17c   :  { %v1753_v39 = vpop.eup %1752 }
 0x17d   :  { %v1755_v40 = vpop.eup %1754  ;;  %v1119_v42 = vadd.f32 -1.0, %v1753_v39  ;;  %v828_v39 = vld [vmem:[#allocation10 + $0x68] sm:$0xff] }
 0x17e   :  { %v1120_v43 = vadd.f32 -1.0, %v1755_v40  ;;  %v831_v40 = vld [vmem:[#allocation10 + $0x80] sm:$0xff] }
 0x17f   :  { %v319_v44 = vmul.f32 1.6732632, %v1119_v42  ;;  %v827_v42 = vld [vmem:[#allocation10 + $0x60] sm:$0xff] }
 0x180   :  { %v320_v45 = vmul.f32 1.6732632, %v1120_v43  ;;  %v1669_v43 = vpack.c.bf16 %v831_v40, %v828_v39 }
 0x181   :  { %v323_v46 = vsel %vm321_vm1, %v309_v32, %v319_v44  ;;  %v1665_v32 = vpack.c.bf16 %v825_v29, %v822_v28  ;;  %v830_v44 = vld [vmem:[#allocation10 + $0x78] sm:$0xff]  ;;  %v859_v28 = vld [vmem:[#allocation10 + $0x160] sm:$0xff] }
 0x182   :  { %v325_v47 = vmul.f32 1.050701, %v323_v46  ;;  %v324_v48 = vsel %vm322_vm2, %v310_v33, %v320_v45  ;;  %v824_v33 = vld [vmem:[#allocation10 + $0x48] sm:$0xff]  ;;  %v829_v45 = vld [vmem:[#allocation10 + $0x70] sm:$0xff]  ;;  %v862_v29 = vld [vmem:[#allocation10 + $0x178] sm:$0xff] }
 0x183   :  { %v326_v49 = vmul.f32 1.050701, %v324_v48  ;;  %v1667_v37 = vpack.c.bf16 %v824_v33, %v821_v30  ;;  %v832_v46 = vld [vmem:[#allocation10 + $0x88] sm:$0xff]  ;;  %v1721_v34 = vpack.c.bf16 %v862_v29, %v859_v28 }
 0x184   :  { %440 = vmatmul.mubr.f32.vlgmr.msra.gmra.mrb[2].mxu0 %v325_v47  ;;  %1351 = vmatprep.mubr.f32.mxu1 %v325_v47  ;;  %v1671_v47 = vpack.c.bf16 %v830_v44, %v827_v42  ;;  %v1701_v48 = vpack.c.bf16 %v832_v46, %v829_v45  ;;  %v860_v33 = vld [vmem:[#allocation10 + $0x168] sm:$0xff] }
 0x185   :  { %1352 = vmatmul.mubr.f32.vlgmr.msra.gmra.mrb[2].mxu1 %v326_v49  ;;  %445 = vmatprep.mubr.f32.mxu0 %v1913_v1 }
 0x186   :  { %1615 = vmatpush3.bf16.msra.mxu1 %v2070_v5  ;;  %1401 = vmatprep.mubr.msk.f32.mxu1 %vm1912_vm0, %v1913_v1 }
 0x187   :  { %1616 = vmatprep.subr.bf16.mxu1 %v1911_v0 }
 0x188   :  { %446 = vmatmul.mubr.f32.gmra.mrb[4].mxu0 %v326_v49  ;;  %v834_v49 = vld [vmem:[#allocation10 + $0x98] sm:$0xff] }
 0x189   :  { %1366 = vmatprep.mubr.msk.f32.mxu0 %vm533_vm3, %v2158_v50 }
 0x18a   :  { %1618 = vmatpush3.bf16.msra.mxu1 %v2074_v7 }
 0x18b   :  { %1619 = vmatprep.subr.bf16.mxu1 %v1911_v0 }
 0x18e   :  { %1621 = vmatpush3.bf16.msra.mxu1 %v2090_v15 }
 0x18f   :  { %1622 = vmatprep.subr.bf16.mxu1 %v1911_v0 }
 0x192   :  { %1624 = vmatpush3.bf16.msra.mxu1 %v2096_v21 }
 0x193   :  { %1625 = vmatprep.subr.bf16.mxu1 %v1911_v0 }
 0x196   :  { %1627 = vmatpush3.bf16.msra.mxu1 %v2102_v26 }
 0x197   :  { %1628 = vmatprep.subr.bf16.mxu1 %v1911_v0 }
 0x19a   :  { %1630 = vmatpush3.bf16.msra.mxu1 %v2108_v31 }
 0x19b   :  { %1631 = vmatprep.subr.bf16.mxu1 %v1911_v0 }
 0x19e   :  { %1633 = vmatpush3.bf16.msra.mxu1 %v2114_v36 }
 0x19f   :  { %1634 = vmatprep.subr.bf16.mxu1 %v1911_v0 }
 0x1a2   :  { %1636 = vmatpush3.bf16.msra.mxu1 %v2120_v41 }
 0x1a3   :  { %1662 = vmatprep.subr.bf16.mxu1 %v1661_v18 }
 0x257   :  { %v441_v51 = vpop.f32.mrb[2].mxu0 }
 0x258   :  { %v443_v52 = vpop.f32.mrb[3].mxu0  ;;  %v1353_v53 = vpop.f32.mrb[2].mxu1 }
 0x259   :  { %v518_v54 = vpop.f32.mrb[3].mxu1 }
 0x25a   :  { %v1609_v55 = vpack.c.bf16 %v1353_v53, %v518_v54  ;;  %v836_v54 = vld [vmem:[#allocation10 + $0xa8] sm:$0xff] }
 0x25b   :  { %v447_v56 = vpop.f32.mrb[4].mxu0 }
 0x25c   :  { %v1601_v57 = vpack.c.bf16 %v447_v56, %v441_v51  ;;  %v449_v58 = vpop.f32.mrb[5].mxu0  ;;  %v837_v51 = vld [vmem:[#allocation10 + $0xb0] sm:$0xff]  ;;  %v838_v56 = vld [vmem:[#allocation10 + $0xb8] sm:$0xff] }
 0x25d   :  { %v1605_v59 = vpack.c.bf16 %v449_v58, %v443_v52  ;;  %v833_v52 = vld [vmem:[#allocation10 + $0x90] sm:$0xff]  ;;  %v1673_v53 = vpack.c.bf16 %v837_v51, %v834_v49  ;;  %v843_v58 = vld [vmem:[#allocation10 + $0xe0] sm:$0xff] }
 0x25e   :  { %1602 = vmatprep.subr.bf16.mxu0 %v1601_v57  ;;  %v616_v51 = vld [vmem:[%s2241_s8] sm:$0x1] }
 0x25f   :  { %1604 = vmatpush3.bf16.msra.mxu0 %v1601_v57  ;;  %v840_v57 = vld [vmem:[#allocation10 + $0xc8] sm:$0xff] }
 0x260   :  { %1606 = vmatprep.subr.bf16.mxu0 %v1605_v59 }
 0x263   :  { %1608 = vmatpush3.bf16.msra.mxu0 %v1605_v59 }
 0x264   :  { %1610 = vmatprep.subr.bf16.mxu0 %v1609_v55 }
 0x267   :  { %1612 = vmatpush3.bf16.msra.mxu0 %v1609_v55  ;;  %v835_v55 = vld [vmem:[#allocation10 + $0xa0] sm:$0xff] }
 0x268   :  { %1637 = vmatprep.subr.bf16.mxu0 %v1911_v0  ;;  %v1705_v59 = vpack.c.bf16 %v838_v56, %v835_v55 }
 0x26a   :  { %1367 = vmatmul.mubr.msk.f32.vlgmr.msra.gmra.mrb[6].mxu0 %vm533_vm3, %v2162_v60 }
 0x26b   :  { %1639 = vmatpush3.bf16.msra.mxu0 %v2070_v5  ;;  %1436 = vmatprep.mubr.msk.f32.mxu0 %vm1912_vm0, %v1913_v1  ;;  %v1121_v5 = vld [vmem:[%s2239_s6] ss:$0 sm:$0xff] }
 0x26c   :  { %1640 = vmatprep.subr.bf16.mxu0 %v1911_v0 }
 0x26f   :  { %1642 = vmatpush3.bf16.msra.mxu0 %v2074_v7 }
 0x270   :  { %1643 = vmatprep.subr.bf16.mxu0 %v1911_v0 }
 0x273   :  { %1645 = vmatpush3.bf16.msra.mxu0 %v2090_v15 }
 0x274   :  { %1646 = vmatprep.subr.bf16.mxu0 %v1911_v0 }
 0x277   :  { %1648 = vmatpush3.bf16.msra.mxu0 %v2096_v21 }
 0x278   :  { %1649 = vmatprep.subr.bf16.mxu0 %v1911_v0 }
 0x27b   :  { %1651 = vmatpush3.bf16.msra.mxu0 %v2102_v26 }
 0x27c   :  { %1652 = vmatprep.subr.bf16.mxu0 %v1911_v0 }
 0x27f   :  { %1654 = vmatpush3.bf16.msra.mxu0 %v2108_v31 }
 0x280   :  { %1655 = vmatprep.subr.bf16.mxu0 %v1911_v0 }
 0x283   :  { %1657 = vmatpush3.bf16.msra.mxu0 %v2114_v36 }
 0x284   :  { %1658 = vmatprep.subr.bf16.mxu0 %v1911_v0 }
 0x287   :  { %1660 = vmatpush3.bf16.msra.mxu0 %v2120_v41 }
 0x288   :  { %1694 = vmatprep.subr.bf16.mxu0 %v1693_v27 }
 0x33d   :  { %v1368_v7 = vpop.f32.mrb[6].mxu0 }
 0x33e   :  { %v2187_v15 = vadd.f32 %v1368_v7, %v1121_v5  ;;  %v606_v21 = vpop.f32.mrb[7].mxu0  ;;  %v841_v7 = vld [vmem:[#allocation10 + $0xd0] sm:$0xff] }
 0x33f   :  { %v2189_v26 = vadd.f32 %v1121_v5, %v606_v21  ;;  %v1675_v5 = vpack.c.bf16 %v836_v54, %v833_v52  ;;  %v844_v21 = vld [vmem:[#allocation10 + $0xe8] sm:$0xff] }
 0x340   :  { %v626_v31 = vmul.f32 %v2187_v15, %v2187_v15 }
 0x341   :  { %v618_v36 = vadd.f32 %v2187_v15, %v2189_v26  ;;  %v625_v0 = vmul.f32 %v2189_v26, %v2189_v26 }
 0x343   :  { %v619_v41 = vrot.slane %v618_v36, 4  ;;  %v627_v61 = vadd.f32 %v626_v31, %v625_v0  ;;  %v1677_v31 = vpack.c.bf16 %v843_v58, %v840_v57  ;;  %v842_v0 = vld [vmem:[#allocation10 + $0xd8] sm:$0xff] }
 0x345   :  { %v620_v62 = vadd.f32 %v619_v41, %v618_v36  ;;  %v628_v63 = vrot.slane %v627_v61, 4  ;;  %v839_v36 = vld [vmem:[#allocation10 + $0xc0] sm:$0xff]  ;;  %v846_v41 = vld [vmem:[#allocation10 + $0xf8] sm:$0xff] }
 0x347   :  { %v621_v2 = vrot.slane %v620_v62, 2  ;;  %v629_v3 = vadd.f32 %v628_v63, %v627_v61  ;;  %v849_v61 = vld [vmem:[#allocation10 + $0x110] sm:$0xff]  ;;  %v1679_v63 = vpack.c.bf16 %v842_v0, %v839_v36 }
 0x349   :  { %v622_v4 = vadd.f32 %v621_v2, %v620_v62  ;;  %v630_v6 = vrot.slane %v629_v3, 2  ;;  %v1709_v62 = vpack.c.bf16 %v844_v21, %v841_v7  ;;  %v847_v2 = vld [vmem:[#allocation10 + $0x100] sm:$0xff] }
 0x34b   :  { %v623_v8 = vrot.slane %v622_v4, 1  ;;  %v631_v9 = vadd.f32 %v630_v6, %v629_v3  ;;  %v850_v3 = vld [vmem:[#allocation10 + $0x118] sm:$0xff]  ;;  %v845_v6 = vld [vmem:[#allocation10 + $0xf0] sm:$0xff] }
 0x34d   :  { %v624_v12 = vadd.f32 %v623_v8, %v622_v4  ;;  %v632_v13 = vrot.slane %v631_v9, 1  ;;  %v1681_v4 = vpack.c.bf16 %v849_v61, %v846_v41  ;;  %v848_v8 = vld [vmem:[#allocation10 + $0x108] sm:$0xff] }
 0x34f   :  { %1402 = vmatmul.mubr.f32.vlgmr.msra.gmra.mrb[4].mxu1 %v624_v12  ;;  %v633_v14 = vadd.f32 %v632_v13, %v631_v9  ;;  %v852_v9 = vld [vmem:[#allocation10 + $0x128] sm:$0xff]  ;;  %v855_v12 = vld [vmem:[#allocation10 + $0x140] sm:$0xff]  ;;  %v1713_v13 = vpack.c.bf16 %v850_v3, %v847_v2 }
 0x350   :  { %927 = vmatprep.mubr.f32.mxu1 %v1913_v1  ;;  %1664 = vmatpush1.bf16.msra.mxu1 %v1663_v24  ;;  %v1685_v18 = vpack.c.bf16 %v855_v12, %v852_v9  ;;  %v861_v24 = vld [vmem:[#allocation10 + $0x170] sm:$0xff] }
 0x351   :  { %1437 = vmatmul.mubr.f32.vlgmr.msra.gmra.mrb[8].mxu0 %v633_v14  ;;  %1666 = vmatprep.subr.bf16.mxu1 %v1665_v32  ;;  %v1683_v14 = vpack.c.bf16 %v848_v8, %v845_v6  ;;  %v1689_v30 = vpack.c.bf16 %v861_v24, %v858_v23  ;;  %v857_v32 = vld [vmem:[#allocation10 + $0x150] sm:$0xff] }
 0x352   :  { %1696 = vmatpush3.bf16.msra.mxu0 %v1693_v27  ;;  %v1687_v27 = vpack.c.bf16 %v854_v22, %v851_v20  ;;  %v1691_v35 = vpack.c.bf16 %v860_v33, %v857_v32 }
 0x353   :  { %1698 = vmatprep.subr.bf16.mxu0 %v1697_v38 }
 0x354   :  { %1668 = vmatpush1.bf16.msra.mxu1 %v1667_v37 }
 0x355   :  { %1670 = vmatprep.subr.bf16.mxu1 %v1669_v43 }
 0x356   :  { %1700 = vmatpush3.bf16.msra.mxu0 %v1697_v38 }
 0x357   :  { %1702 = vmatprep.subr.bf16.mxu0 %v1701_v48 }
 0x358   :  { %1672 = vmatpush1.bf16.msra.mxu1 %v1671_v47  ;;  %v615_v47 = vld [vmem:[%s2240_s7] sm:$0x1] }
 0x359   :  { %1674 = vmatprep.subr.bf16.mxu1 %v1673_v53 }
 0x35a   :  { %1704 = vmatpush3.bf16.msra.mxu0 %v1701_v48 }
 0x35b   :  { %1706 = vmatprep.subr.bf16.mxu0 %v1705_v59 }
 0x35c   :  { %1676 = vmatpush1.bf16.msra.mxu1 %v1675_v5 }
 0x35d   :  { %1678 = vmatprep.subr.bf16.mxu1 %v1677_v31 }
 0x35e   :  { %1708 = vmatpush3.bf16.msra.mxu0 %v1705_v59 }
 0x35f   :  { %1710 = vmatprep.subr.bf16.mxu0 %v1709_v62 }
 0x360   :  { %1680 = vmatpush1.bf16.msra.mxu1 %v1679_v63 }
 0x361   :  { %1682 = vmatprep.subr.bf16.mxu1 %v1681_v4 }
 0x362   :  { %1712 = vmatpush3.bf16.msra.mxu0 %v1709_v62 }
 0x363   :  { %1714 = vmatprep.subr.bf16.mxu0 %v1713_v13 }
 0x364   :  { %1684 = vmatpush1.bf16.msra.mxu1 %v1683_v14 }
 0x365   :  { %1686 = vmatprep.subr.bf16.mxu1 %v1685_v18 }
 0x366   :  { %1716 = vmatpush3.bf16.msra.mxu0 %v1713_v13 }
 0x367   :  { %1718 = vmatprep.subr.bf16.mxu0 %v1717_v25 }
 0x368   :  { %1688 = vmatpush1.bf16.msra.mxu1 %v1687_v27 }
 0x369   :  { %1690 = vmatprep.subr.bf16.mxu1 %v1689_v30 }
 0x36a   :  { %1720 = vmatpush3.bf16.msra.mxu0 %v1717_v25 }
 0x36b   :  { %1722 = vmatprep.subr.bf16.mxu0 %v1721_v34 }
 0x36c   :  { %1692 = vmatpush1.bf16.msra.mxu1 %v1691_v35 }
 0x36e   :  { %1724 = vmatpush3.bf16.msra.mxu0 %v1721_v34 }
 0x422   :  { %v700_v37 = vpop.f32.mrb[4].mxu1 }
 0x423   :  { %v704_v38 = vmul.f32 0.001953125, %v700_v37  ;;  %v1403_v39 = vpop.f32.mrb[5].mxu1 }
 0x424   :  { %v771_v40 = vpop.f32.mrb[8].mxu0 }
 0x425   :  { %v776_v42 = vmul.f32 %v704_v38, %v704_v38  ;;  %v775_v43 = vmul.f32 0.001953125, %v771_v40  ;;  %v1438_v44 = vpop.f32.mrb[9].mxu0 }
 0x427   :  { %v777_v45 = vsub.f32 %v775_v43, %v776_v42 }
 0x429   :  { %v778_v46 = vadd.f32 1e-05, %v777_v45 }
 0x42b   :  { %1756 = vrsqrt.f32 %v778_v46 }
 0x435   :  { %v1757_v48 = vpop.eup %1756 }
 0x436   :  { %v780_v49 = vmul.f32 %v1757_v48, %v615_v47 }
 0x438   :  { %v781_v52 = vmul.f32 %v780_v49, %v704_v38  ;;  %v787_v53 = vrot.slane %v780_v49, %v2131_v19 }
 0x43a   :  { %v782_v54 = vsub.f32 %v616_v51, %v781_v52  ;;  %v789_v55 = vmul.f32 %v787_v53, %v2189_v26  ;;  %v790_v57 = vmul.f32 %v787_v53, %v2187_v15 }
 0x43c   :  { %v795_v56 = vrot.slane %v782_v54, %v2131_v19 }
 0x43e   :  { %v797_v58 = vadd.f32 %v795_v56, %v789_v55  ;;  %v798_v59 = vadd.f32 %v795_v56, %v790_v57 }
 0x440   :  { %v799_v5 = vmin.f32 %v797_v58, 0.0  ;;  %v800_v7 = vmin.f32 %v798_v59, 0.0  ;;  %vm809_vm4 = vcmp.gt.f32.partialorder %v797_v58, 0.0  ;;  %vm810_vm5 = vcmp.gt.f32.partialorder %v798_v59, 0.0 }
 0x442   :  { %v801_v21 = vmul.f32 1.442695, %v799_v5  ;;  %v803_v31 = vmul.f32 1.442695, %v800_v7 }
 0x444   :  { %1758 = vpow2.f32 %v801_v21 }
 0x445   :  { %1760 = vpow2.f32 %v803_v31 }
 0x44e   :  { %v1759_v36 = vpop.eup %1758 }
 0x44f   :  { %v1761_v0 = vpop.eup %1760  ;;  %v1124_v41 = vadd.f32 -1.0, %v1759_v36 }
 0x450   :  { %v1125_v61 = vadd.f32 -1.0, %v1761_v0 }
 0x451   :  { %v807_v62 = vmul.f32 1.6732632, %v1124_v41 }
 0x452   :  { %v808_v63 = vmul.f32 1.6732632, %v1125_v61 }
 0x453   :  { %v811_v26 = vsel %vm809_vm4, %v797_v58, %v807_v62 }
 0x454   :  { %v813_v19 = vmul.f32 1.050701, %v811_v26  ;;  %v812_v2 = vsel %vm810_vm5, %v798_v59, %v808_v63 }
 0x455   :  { %v814_v15 = vmul.f32 1.050701, %v812_v2 }
 0x456   :  { %928 = vmatmul.mubr.f32.vlgmr.msra.gmra.mrb[6].mxu1 %v813_v19  ;;  %1471 = vmatprep.mubr.f32.mxu0 %v813_v19 }
 0x457   :  { %1472 = vmatmul.mubr.f32.vlgmr.msra.gmra.mrb[10].mxu0 %v814_v15  ;;  %933 = vmatprep.mubr.f32.mxu1 %v1913_v1  ;;  %v1126_v1 = vld [vmem:[%s2243_s10] ss:$0 sm:$0xff] }
 0x45a   :  { %934 = vmatmul.mubr.f32.gmra.mrb[8].mxu1 %v814_v15 }
 0x45b   :  { %1486 = vmatprep.mubr.msk.f32.mxu1 %vm533_vm3, %v2158_v50 }
 0x529   :  { %v929_v3 = vpop.f32.mrb[6].mxu1 }
 0x52a   :  { %v931_v4 = vpop.f32.mrb[7].mxu1  ;;  %v1473_v6 = vpop.f32.mrb[10].mxu0 }
 0x52b   :  { %v1006_v8 = vpop.f32.mrb[11].mxu0 }
 0x52c   :  { %v1733_v9 = vpack.c.bf16 %v1473_v6, %v1006_v8 }
 0x52d   :  { %v935_v12 = vpop.f32.mrb[8].mxu1 }
 0x52e   :  { %v1725_v13 = vpack.c.bf16 %v935_v12, %v929_v3  ;;  %v937_v14 = vpop.f32.mrb[9].mxu1 }
 0x52f   :  { %v1729_v16 = vpack.c.bf16 %v937_v14, %v931_v4 }
 0x530   :  { %1726 = vmatprep.subr.bf16.mxu1 %v1725_v13 }
 0x531   :  { %1728 = vmatpush3.bf16.msra.mxu1 %v1725_v13 }
 0x532   :  { %1730 = vmatprep.subr.bf16.mxu1 %v1729_v16 }
 0x535   :  { %1732 = vmatpush3.bf16.msra.mxu1 %v1729_v16 }
 0x536   :  { %1734 = vmatprep.subr.bf16.mxu1 %v1733_v9 }
 0x539   :  { %1736 = vmatpush3.bf16.msra.mxu1 %v1733_v9 }
 0x53c   :  { %1487 = vmatmul.mubr.msk.f32.vlgmr.msra.gmra.mrb[10].mxu1 %vm533_vm3, %v2162_v60 }
 0x60f   :  { %v1488_v50 = vpop.f32.mrb[10].mxu1 }
 0x610   :  { %v1093_v17 = vadd.f32 %v1488_v50, %v1126_v1  ;;  %v1087_v18 = vpop.f32.mrb[11].mxu1 }
 0x611   :  { %v1088_v20 = vadd.f32 %v1126_v1, %v1087_v18 }
 0x612   :  { %v1097_v22 = vadd.f32 %v1093_v17, %v2080_v11 }
 0x613   :  { %v1096_v23 = vadd.f32 %v1088_v20, %v2078_v10 }
 0x614   :  { %1099 = vst [vmem:[#allocation11 + $0x8] sm:$0xff] %v1097_v22 }
 0x615   :  { %1098 = vst [vmem:[#allocation11] sm:$0xff] %v1096_v23 }
 0x616   :  { %1883 = shalt.err (!%p1880_p2)
}
 0x617   :  { %s1884_s17 = scalar_lea.hbm %s2244_s11, 256 }
 0x618   :  { %p1885_p3 = scmp.ne.s32.totalorder %s2244_s11, %s1884_s17  ;;  %p1888_p4 = scmp.lt.u32.totalorder %s1884_s17, %s2244_s11 }
 0x61a   :  { %p1890_p5 = pnand %p1888_p4, %p1885_p3 }
 0x61c   :  { %1893 = shalt.err (!%p1890_p5)
}
 0x61d   :  { %1111 = dma.vmem_to_hbm [thread:$0]  %s1106_s0, 256, %s2244_s11, [#allocation4], %s1904_s29, %s1904_s29, %s1905_s30  }
 0x61e   :  { %1900 = dma.done.wait [#allocation4], 256  }
 0x61f   :  { %1901 = vsyncadd [#allocation4], 4294967040 }
 0x620   :  { %1115 = vsyncpa [#allocation3], 1 }
 0x621   :  { %1116 = vsyncpa [#allocation6], 1 }
 0x622   :  { %1117 = vsyncpa [#allocation9], 1 }
 0x623   :  { %1118 = vsyncpa [#allocation4], 1 }

</bundles_post_ra>
